<compile_context>
chip_gen: v7x
topology: tpu7x:2x2x1
jax: 0.10.0
libtpu: 0.0.40
codegen_flags: <defaults>
</compile_context>

<pallas_src>
import functools

import jax
import jax.numpy as jnp
from jax import lax
from jax.experimental import pallas as pl
from jax.experimental.pallas import tpu as pltpu


def _round_up(x, m):
    return ((x + m - 1) // m) * m


# Per-grid-step budget for the (double-buffered) x slab.  12 MiB per buffer
# keeps the ~0.35 us fixed per-step overhead <5% of the per-step DMA time even
# at v7x's ~3.2 TB/s HBM, while the total VMEM footprint (x double-buffer +
# classifier weight + accumulator + output) stays well under 64 MiB.
_DEFAULT_X_VMEM_BUDGET = 24 * 1024 * 1024


def _deepmil_kernel(x_ref, wc_ref, out_ref, acc_ref, *,
                    n_inst, n_feat, tn, ti, mm_dtype):
    """grid = (batch tiles [parallel], feature chunks [parallel],
               instance tiles [arbitrary / reduction, innermost]).

    Attention weights are provably all 1.0 (softmax over a size-1 axis), so the
    MIL pooling is an unweighted instance sum; this feature chunk's classifier
    contribution is one (TB, TI) @ (TI, 128) MXU matmul (chunks summed in the
    wrapper, bias added there once).
    """
    i = pl.program_id(1)   # feature-chunk index
    k = pl.program_id(2)   # instance-tile index (reduction)

    @pl.when(k == 0)
    def _init():
        acc_ref[...] = jnp.zeros_like(acc_ref)

    xv = x_ref[...].astype(jnp.float32)                      # (TB, TN, TI)
    if n_inst % tn != 0:
        # Ragged last instance tile: mask out-of-bounds rows in-kernel instead
        # of padding x in HBM (saves a full extra read+write pass over x).
        row = lax.broadcasted_iota(jnp.int32, (1, tn, ti), 1)
        xv = jnp.where(k * tn + row < n_inst, xv, 0.0)
    acc_ref[...] += jnp.sum(xv, axis=1)                      # (TB, TI)

    @pl.when(k == pl.num_programs(2) - 1)
    def _finalize():
        m = acc_ref[...]
        if n_feat % ti != 0:
            # Ragged last feature chunk: zero the garbage columns before the
            # classifier matmul (wc's padded rows are real zeros).
            col = lax.broadcasted_iota(jnp.int32, (1, ti), 1)
            m = jnp.where(i * ti + col < n_feat, m, 0.0)
        out_ref[...] = jnp.dot(m.astype(mm_dtype), wc_ref[...],
                               preferred_element_type=jnp.float32)


def _choose_batch_tile(batch):
    """Bags per grid step.  <=16 bags: one tile (block == full dim is always a
    legal layout).  Otherwise sublane-aligned, at least two batch tiles (keeps
    both v7x TensorCores busy), up to 256 rows (one v6e/v7x MXU LHS pass)."""
    if batch <= 16:
        return batch
    n_tiles = max(2, pl.cdiv(batch, 256))
    return min(256, _round_up(pl.cdiv(batch, n_tiles), 8))


def deepmil_forward(x, params, *, matmul_dtype=jnp.float32,
                    x_vmem_budget_bytes=_DEFAULT_X_VMEM_BUDGET):
    """Pallas DeepMil forward.

    params = (w1, b1, w2, b2, wc, bc), weights stored (in, out) (transpose of
    torch's nn.Linear.weight).  Only (wc, bc) are used: the attention
    parameters cannot affect this module's output (softmax over a length-1
    axis == 1), see module docstring.

    x is streamed unmodified (no HBM padding pass).  The kernel is purely
    HBM-bandwidth-bound on x, so feeding bf16 x roughly halves wall-clock on
    all generations (the in-kernel accumulation stays f32 either way).
    matmul_dtype controls only the tiny classifier matmul; default f32 keeps
    the result tight against an f32 reference.
    """
    w1, b1, w2, b2, wc, bc = params
    del w1, b1, w2, b2            # provably dead in this forward
    B, N, I = x.shape
    C = wc.shape[1]
    itemsize = jnp.dtype(x.dtype).itemsize
    sub = max(8, 32 // itemsize)          # sublane multiple: f32 8, bf16 16, i8 32
    C_pad = _round_up(C, 128)             # lane-dense (unmasked) output stores

    TB = _choose_batch_tile(B)
    nb = pl.cdiv(B, TB)

    # Feature-chunk size TI: full I when even a minimal (TB, sub, I) slab fits
    # the budget; otherwise a 128-multiple chunk (prevents VMEM OOM at large I).
    max_ti = x_vmem_budget_bytes // (2 * TB * sub * itemsize)
    if I <= max(max_ti, 128):
        TI = I
    else:
        TI = max(128, (max_ti // 128) * 128)
    # Small-batch dual-TC (v7x): with a single batch tile, split the feature
    # dim so the second "parallel" grid axis keeps both TensorCores busy.
    if nb == 1 and I >= 256 and pl.cdiv(I, TI) == 1:
        TI = min(TI, _round_up(pl.cdiv(I, 2), 128))
    ni = pl.cdiv(I, TI)

    # Instance tile TN: as large as the double-buffered budget allows, chosen
    # to (nearly) divide N so padding waste is at most one sublane group.
    tn_budget = max(
        sub, (x_vmem_budget_bytes // (2 * TB * TI * itemsize)) // sub * sub)
    if N <= tn_budget:
        TN = N
    else:
        TN = _round_up(pl.cdiv(N, pl.cdiv(N, tn_budget)), sub)
    nn = pl.cdiv(N, TN)

    # Classifier weight: zero-pad feature rows to ni*TI and classes to 128
    # lanes (tiny; the big operand x is NOT padded or copied).
    wc_p = jnp.pad(wc, ((0, ni * TI - I), (0, C_pad - C))).astype(matmul_dtype)

    kernel = functools.partial(_deepmil_kernel, n_inst=N, n_feat=I,
                               tn=TN, ti=TI, mm_dtype=matmul_dtype)

    # Explicit scoped-VMEM limit (v5e's default is only 16 MiB); with the
    # default budget this is ~32 MiB, under v7x's 64 MiB physical VMEM.
    vmem_need = (2 * TB * TN * TI * itemsize                          # x dbl buf
                 + 2 * TI * C_pad * jnp.dtype(matmul_dtype).itemsize  # wc dbl buf
                 + TB * TI * 4                                        # acc scratch
                 + 2 * TB * C_pad * 4)                                # out dbl buf
    vmem_limit = int(max(32 * 1024 * 1024, vmem_need + 4 * 1024 * 1024))

    out = pl.pallas_call(
        kernel,
        out_shape=jax.ShapeDtypeStruct((ni, B, C_pad), jnp.float32),
        grid=(nb, ni, nn),
        in_specs=[
            pl.BlockSpec((TB, TN, TI), lambda b, i, k: (b, k, i)),   # x slab
            pl.BlockSpec((TI, C_pad), lambda b, i, k: (i, 0)),       # classifier W
        ],
        out_specs=pl.BlockSpec((None, TB, C_pad), lambda b, i, k: (i, b, 0)),
        scratch_shapes=[pltpu.VMEM((TB, TI), jnp.float32)],          # instance sum
        compiler_params=pltpu.CompilerParams(
            dimension_semantics=("parallel", "parallel", "arbitrary"),
            vmem_limit_bytes=vmem_limit),
    )(x, wc_p)

    # Sum feature-chunk partials (ni == 1 in the common case), drop padded
    # class lanes, add the bias once.
    y = jnp.sum(out, axis=0)[:, :C] + bc
    return jnp.squeeze(y)      # matches torch .squeeze(): (C,) when B == 1


def init_params(key, input_size, hidden_size, num_classes):
    # PyTorch-Linear-like uniform(-1/sqrt(fan_in), +1/sqrt(fan_in)) init.
    ks = jax.random.split(key, 6)

    def u(k, shape, fan_in):
        bound = 1.0 / jnp.sqrt(fan_in)
        return jax.random.uniform(k, shape, jnp.float32, -bound, bound)

    w1 = u(ks[0], (input_size, hidden_size), input_size)
    b1 = u(ks[1], (1, hidden_size), input_size)
    w2 = u(ks[2], (hidden_size, 1), hidden_size)
    b2 = u(ks[3], (1, 1), hidden_size)
    wc = u(ks[4], (input_size, num_classes), input_size)
    bc = u(ks[5], (1, num_classes), input_size)
    return (w1, b1, w2, b2, wc, bc)


def deepmil_reference(x, params):
    """Pure-JAX reference mirroring the torch forward literally (including the
    dead attention path and the size-1-axis softmax)."""
    w1, b1, w2, b2, wc, bc = params
    hp = jax.lax.Precision.HIGHEST
    a = jnp.tanh(x @ w1 + b1) @ w2 + b2                 # (B, N, 1)
    a = jnp.transpose(a, (0, 2, 1))                     # (B, 1, N)
    a = jax.nn.softmax(a, axis=1)                       # softmax over size-1 dim
    m = jnp.matmul(a, x, precision=hp)                  # (B, 1, I)
    y = jnp.matmul(m, wc, precision=hp) + bc            # (B, 1, C)
    return jnp.squeeze(y)


if __name__ == "__main__":
    root_key = jax.random.PRNGKey(0)

    def run_case(B, N, I, H, C, **kwargs):
        kx, kp = jax.random.split(jax.random.fold_in(root_key, B * 1000 + N))
        x = jax.random.normal(kx, (B, N, I), dtype=jnp.float32)
        params = init_params(kp, I, H, C)
        y = jax.block_until_ready(deepmil_forward(x, params, **kwargs))
        y_ref = deepmil_reference(x, params)
        assert y.shape == y_ref.shape, (y.shape, y_ref.shape)
        # Tolerance allows for the MXU's default f32 matmul precision.
        assert jnp.allclose(y, y_ref, atol=1e-2, rtol=1e-2), (y, y_ref)

    # Primary small case, matching the module defaults (input_size=4, classes=3).
    run_case(B=2, N=8, I=4, H=32, C=3)
    # Ragged instance axis + multi-step reduction (tiny slab budget forces
    # TN tiling, exercises the in-kernel instance mask and init/finalize path).
    run_case(B=5, N=37, I=4, H=8, C=3, x_vmem_budget_bytes=4096)
    # Feature-dim chunking + small-batch dual-core split (nb == 1, I >= 256),
    # with a ragged last feature chunk and the wrapper chunk-sum.
    run_case(B=1, N=16, I=384, H=8, C=3)

    print("KERNEL_OK")
</pallas_src>

<mosaic_0001>
module attributes {stable_mosaic.version = 11 : i64} {
  func.func @_deepmil_kernel(%arg0: i32, %arg1: i32, %arg2: i32, %arg3: memref<2x8x4xf32, #tpu.memory_space<vmem>>, %arg4: memref<4x128xf32, #tpu.memory_space<vmem>>, %arg5: memref<1x2x128xf32, #tpu.memory_space<vmem>>, %arg6: memref<2x4xf32, #tpu.memory_space<vmem>>) attributes {dimension_semantics = [#tpu.dimension_semantics<parallel>, #tpu.dimension_semantics<parallel>, #tpu.dimension_semantics<arbitrary>], iteration_bounds = array<i64: 1, 1, 1>, scalar_prefetch = 0 : i64, scratch_operands = 1 : i64, tpu.core_type = #tpu.core_type<tc>, window_params = [{transform_indices = @transform_0, window_bounds = array<i64: 2, 8, 4>}, {transform_indices = @transform_1, window_bounds = array<i64: 4, 128>}, {transform_indices = @transform_2, window_bounds = array<i64: 1, 2, 128>}]} {
    %c0_i32 = arith.constant 0 : i32
    %0 = arith.cmpi eq, %arg2, %c0_i32 : i32
    %1 = arith.extui %0 : i1 to i32
    %c0_i32_0 = arith.constant 0 : i32
    %2 = arith.cmpi ne, %1, %c0_i32_0 : i32
    scf.if %2 {
      %cst_9 = arith.constant 0.000000e+00 : f32
      %11 = vector.broadcast %cst_9 : f32 to vector<2x4xf32>
      %c0_10 = arith.constant 0 : index
      %c0_11 = arith.constant 0 : index
      %12 = vector.load %arg6[%c0_10, %c0_11] : memref<2x4xf32, #tpu.memory_space<vmem>>, vector<2x4xf32>
      tpu.vector_store %arg6[%c0_10, %c0_11], %11 {strides = array<i32>} : memref<2x4xf32, #tpu.memory_space<vmem>>, vector<2x4xf32>,
    } else {
    }
    %c0 = arith.constant 0 : index
    %c0_1 = arith.constant 0 : index
    %c0_2 = arith.constant 0 : index
    %3 = vector.load %arg3[%c0, %c0_1, %c0_2] : memref<2x8x4xf32, #tpu.memory_space<vmem>>, vector<2x8x4xf32>
    %c0_3 = arith.constant 0 : index
    %c0_4 = arith.constant 0 : index
    %4 = vector.load %arg6[%c0_3, %c0_4] : memref<2x4xf32, #tpu.memory_space<vmem>>, vector<2x4xf32>
    %cst = arith.constant dense<0.000000e+00> : vector<2x4xf32>
    %5 = vector.multi_reduction <add>, %3, %cst [1] : vector<2x8x4xf32> to vector<2x4xf32>
    %6 = arith.addf %4, %5 : vector<2x4xf32>
    %c0_5 = arith.constant 0 : index
    %c0_6 = arith.constant 0 : index
    %7 = vector.load %arg6[%c0_5, %c0_6] : memref<2x4xf32, #tpu.memory_space<vmem>>, vector<2x4xf32>
    tpu.vector_store %arg6[%c0_5, %c0_6], %6 {strides = array<i32>} : memref<2x4xf32, #tpu.memory_space<vmem>>, vector<2x4xf32>,
    %c0_i32_7 = arith.constant 0 : i32
    %8 = arith.cmpi eq, %arg2, %c0_i32_7 : i32
    %9 = arith.extui %8 : i1 to i32
    %c0_i32_8 = arith.constant 0 : i32
    %10 = arith.cmpi ne, %9, %c0_i32_8 : i32
    scf.if %10 {
      %c0_9 = arith.constant 0 : index
      %c0_10 = arith.constant 0 : index
      %11 = vector.load %arg6[%c0_9, %c0_10] : memref<2x4xf32, #tpu.memory_space<vmem>>, vector<2x4xf32>
      %c0_11 = arith.constant 0 : index
      %c0_12 = arith.constant 0 : index
      %12 = vector.load %arg4[%c0_11, %c0_12] : memref<4x128xf32, #tpu.memory_space<vmem>>, vector<4x128xf32>
      %cst_13 = arith.constant dense<0.000000e+00> : vector<2x128xf32>
      %13 = tpu.matmul %11, %12, %cst_13 {dimension_numbers = #tpu.dot_dimension_numbers<[1], [0], [0], [1], [0, 0, 1, 1], [], []>} : vector<2x4xf32>, vector<4x128xf32>, vector<2x128xf32> -> vector<2x128xf32>
      %c0_14 = arith.constant 0 : index
      %c0_15 = arith.constant 0 : index
      %c0_16 = arith.constant 0 : index
      %14 = vector.load %arg5[%c0_14, %c0_15, %c0_16] : memref<1x2x128xf32, #tpu.memory_space<vmem>>, vector<1x2x128xf32>
      %15 = vector.shape_cast %14 : vector<1x2x128xf32> to vector<2x128xf32>
      %16 = vector.shape_cast %13 : vector<2x128xf32> to vector<1x2x128xf32>
      tpu.vector_store %arg5[%c0_14, %c0_15, %c0_16], %16 {strides = array<i32>} : memref<1x2x128xf32, #tpu.memory_space<vmem>>, vector<1x2x128xf32>,
    } else {
    }
    return
  }
  func.func @transform_0(%arg0: i32, %arg1: i32, %arg2: i32) -> (i32, i32, i32) {
    %c0_i32 = arith.constant 0 : i32
    return %arg0, %arg2, %arg1 : i32, i32, i32
  }
  func.func @transform_1(%arg0: i32, %arg1: i32, %arg2: i32) -> (i32, i32) {
    %c0_i32 = arith.constant 0 : i32
    %c0_i32_0 = arith.constant 0 : i32
    return %arg1, %c0_i32 : i32, i32
  }
  func.func @transform_2(%arg0: i32, %arg1: i32, %arg2: i32) -> (i32, i32, i32) {
    %c0_i32 = arith.constant 0 : i32
    %c0_i32_0 = arith.constant 0 : i32
    return %arg1, %arg0, %c0_i32 : i32, i32, i32
  }
}

</mosaic_0001>

<bundles_post_ra>
// kernel: tpu_custom_call.1
= control target key start
LH: loop header
LB: loop body
LE: loop exit
PB: predicated region body
PF: predicated region fallthrough
CT: control target
= control target key end

     0   :  { %vm16_vm0 = vcmask 25600   ;;  %vm52_vm1 = vcmask 1043456   ;;  %v177_v1 = vmov 0.0   ;;  %vm178_vm2 = vmmov 0   ;;  %s221_s0 = inlined_call_operand.vmem [shape: f32[2,8,4], index: 0, kind: input, shape index: {}]   ;;  %s222_s1 = inlined_call_operand.vmem [shape: f32[4,128], index: 1, kind: input, shape index: {}]   ;;  %s223_s2 = inlined_call_operand.hbm [shape: f32[1,2,128], index: 2, kind: output, shape index: {}]  }
   0x1   :  { %v48_v0 = vld [vmem:[%s222_s1] sm:$0xf]  ;;  %17 = vst.msk [vmem:[#allocation2] sm:$0x3] %vm16_vm0, %v177_v1  ;;  %145 = vmatprep.subr.mxu0 %v177_v1  ;;  %147 = vmatprep.mubr.msk.f32.mxu0 %vm178_vm2, %v177_v1  ;;  %v19_v3 = vld [vmem:[%s221_s0 + $0x8] sm:$0xff]  ;;  %vm21_vm3 = vcmask 31744  }
   0x2   :  { %v18_v2 = vld [vmem:[%s221_s0] sm:$0xff] }
   0x3   :  { %7 = vsyncpa [#allocation4], 0  ;;  %146 = vmatpush3.msk.msra.mxu0 %vm52_vm1, %v48_v0  ;;  %v22_v4 = vsel %vm21_vm3, %v18_v2, 0.0  ;;  %v29_v5 = vsel %vm21_vm3, %v19_v3, 0.0  ;;  %vm38_vm4 = vcmask 1041409   ;;  %s179_s0 = smov [#allocation3]  }
   0x4   :  { %v23_v6 = vrot.slane %v22_v4, 4  ;;  %v30_v7 = vrot.slane %v29_v5, 4  ;;  %s133_s1 = sshll.u32 %s179_s0, 4  ;;  %s134_s1 = int_to_ptr.vmem [resolvable:$true] %s133_s1 }
   0x5   :  { %s153_s15 = scalar_lea.vmem %s134_s1, 32  ;;  %p158_p1 = scmp.lt.s32.totalorder %s134_s1, %s134_s1 }
   0x6   :  { %v24_v8 = vadd.f32 %v23_v6, %v22_v4  ;;  %v31_v9 = vadd.f32 %v30_v7, %v29_v5  ;;  %p154_p0 = scmp.ne.s32.totalorder %s134_s1, %s153_s15  ;;  %p159_p2 = scmp.lt.s32.totalorder %s153_s15, %s153_s15 }
   0x8   :  { %v25_v10 = vrot.slane %v24_v8, 2  ;;  %v32_v11 = vrot.slane %v31_v9, 2  ;;  %v20_v16 = vld [vmem:[#allocation2] sm:$0x3]  ;;  %p160_p3 = por %p159_p2, %p158_p1 }
   0xa   :  { %v26_v12 = vadd.f32 %v25_v10, %v24_v8  ;;  %v33_v13 = vadd.f32 %v32_v11, %v31_v9  ;;  %p161_p4 = pnand %p160_p3, %p154_p0 }
   0xc   :  { %v27_v14 = vrot.slane %v26_v12, 1  ;;  %v34_v15 = vrot.slane %v33_v13, 1 }
   0xe   :  { %v28_v17 = vadd.f32 %v27_v14, %v26_v12  ;;  %v35_v18 = vadd.f32 %v34_v15, %v33_v13 }
  0x10   :  { %v39_v19 = vsel %vm38_vm4, %v35_v18, %v28_v17 }
  0x11   :  { %v41_v20 = vadd.f32 %v39_v19, %v20_v16 }
  0x13   :  { %43 = vst.msk [vmem:[#allocation2] sm:$0x3] %vm16_vm0, %v41_v20 }
  0x1a   :  { %v47_v21 = vld [vmem:[#allocation2] sm:$0x3] }
  0x1b   :  { %148 = vmatmul.mubr.msk.f32.vlgmr.msra.gmra.mrb[0].mxu0 %vm21_vm3, %v47_v21 }
  0xee   :  { %v122_v22 = vpop.f32.mrb[0].mxu0 }
  0xef   :  { %126 = vst [vmem:[#allocation3] sm:$0x3] %v122_v22  ;;  %v149_v23 = vpop.f32.mrb[1].mxu0 }
  0xf0   :  { %164 = shalt.err (!%p161_p4)
}
  0xf1   :  { %s165_s18 = scalar_lea.hbm %s223_s2, 32 }
  0xf2   :  { %p166_p5 = scmp.ne.s32.totalorder %s223_s2, %s165_s18  ;;  %p169_p6 = scmp.lt.u32.totalorder %s165_s18, %s223_s2 }
  0xf4   :  { %p171_p7 = pnand %p169_p6, %p166_p5 }
  0xf6   :  { %174 = shalt.err (!%p171_p7)
}
  0xf7   :  { %136 = dma.vmem_to_hbm [thread:$0]  %s134_s1, 32, %s223_s2, [#allocation4]  }
  0xf8   :  { %175 = dma.done.wait [#allocation4], 32  }
  0xf9   :  { %176 = vsyncadd [#allocation4], 4294967264 }
  0xfa   :  { %140 = vsyncpa [#allocation4], 1 }

</bundles_post_ra>
